<compile_context>
chip_gen: v7x
topology: tpu7x:2x2x1
jax: 0.10.0
libtpu: 0.0.40
codegen_flags: <defaults>
</compile_context>

<pallas_src>
import math

import jax
import jax.numpy as jnp
from jax.experimental import pallas as pl
from jax.experimental.pallas import tpu as pltpu


def _round_up(x, m):
    return ((x + m - 1) // m) * m


def _mlp_value_kernel(x_ref, w1_ref, b1_ref, w2_ref, b2_ref, w3_ref, b3_ref, o_ref):
    # x_ref : [TB, Dp] f32        w1_ref: [Dp, Hp] bf16     b1_ref: [1, Hp] f32
    # w2_ref: [Hp, Hp] bf16       b2_ref: [1, Hp]  f32
    # w3_ref: [Hp, 1]  bf16       b3_ref: [1, 1]   f32 (SMEM scalar)
    # o_ref : [TB, 1]  f32
    # Cast x to the matmul dtype on the VPU (free slot under the DMA-bound pipeline);
    # accumulate, bias-add and ReLU stay in f32 (v5e VPU has no bf16).
    x = x_ref[...].astype(w1_ref.dtype)

    h1 = jnp.dot(x, w1_ref[...], preferred_element_type=jnp.float32) + b1_ref[...]
    h1 = jnp.maximum(h1, 0.0)

    h2 = jnp.dot(h1.astype(w2_ref.dtype), w2_ref[...],
                 preferred_element_type=jnp.float32) + b2_ref[...]
    h2 = jnp.maximum(h2, 0.0)

    out = jnp.dot(h2.astype(w3_ref.dtype), w3_ref[...],
                  preferred_element_type=jnp.float32) + b3_ref[0, 0]
    o_ref[...] = out.astype(o_ref.dtype)


def prepare_params(params, compute_dtype=jnp.bfloat16):
    """One-time pad (to 128-lane multiples) + bf16 cast of the MLP parameters.

    Hoisted out of the per-call path: call once per weight update, then reuse the
    returned tuple for every forward pass (so forwards only stream obs).
    """
    w1, b1, w2, b2, w3, b3 = params
    D, H = w1.shape
    Dp, Hp = _round_up(D, 128), _round_up(H, 128)
    w1p = jnp.zeros((Dp, Hp), compute_dtype).at[:D, :H].set(w1.astype(compute_dtype))
    b1p = jnp.zeros((1, Hp), jnp.float32).at[:, :H].set(b1.reshape(1, -1).astype(jnp.float32))
    w2p = jnp.zeros((Hp, Hp), compute_dtype).at[:H, :H].set(w2.astype(compute_dtype))
    b2p = jnp.zeros((1, Hp), jnp.float32).at[:, :H].set(b2.reshape(1, -1).astype(jnp.float32))
    w3p = jnp.zeros((Hp, 1), compute_dtype).at[:H, :].set(w3.astype(compute_dtype))
    b3s = jnp.asarray(b3, jnp.float32).reshape(1, 1)
    return (w1p, b1p, w2p, b2p, w3p, b3s)


def mlp_value_forward(obs, prepared_params, *, block_b=None,
                      vmem_budget_bytes=48 * 1024 * 1024):
    """obs: [B, *obs_shape] -> value: [B, 1] float32.

    `prepared_params` must come from `prepare_params(...)`.
    """
    w1p, b1p, w2p, b2p, w3p, b3s = prepared_params
    B = obs.shape[0]
    x = obs.reshape(B, -1)                      # flatten only; no cast / pad / batch copy
    D = x.shape[1]
    Dp, Hp = w1p.shape
    assert D <= Dp, f"obs dim {D} larger than prepared weight dim {Dp}"
    if D != Dp:
        # Rare unaligned-D case only: pad lanes up to the weight's padded input dim.
        x = jnp.pad(x, ((0, 0), (0, Dp - D)))
    x_itemsize = x.dtype.itemsize

    weight_bytes = ((w1p.size + w2p.size + w3p.size) * w1p.dtype.itemsize
                    + (b1p.size + b2p.size) * 4)

    # ---- batch tile selection ----------------------------------------------------------
    if block_b is None:
        # Largest tile whose double-buffered x stream (+ out) plus single-buffered weights
        # fits the VMEM budget; capped at 2048 rows (mem-bound sweet spot).
        per_row = 2 * Dp * x_itemsize + 2 * 4
        tb = (vmem_budget_bytes - weight_bytes) // per_row
        tb = int(max(128, min(2048, (tb // 128) * 128)))
        # Keep >=2 batch tiles for large batches so ("parallel",) can shard the batch grid
        # axis across both TensorCores (v7x megacore).
        if B >= 1024:
            tb = min(tb, _round_up(pl.cdiv(B, 2), 128))
    else:
        tb = int(block_b)
    tb = min(tb, B)                 # never pad the batch; the last tile may be partial
    if tb < B and tb % 8 != 0:      # non-full blocks must be sublane (8) aligned
        tb = max(8, (tb // 8) * 8)
    TB = tb
    grid = (pl.cdiv(B, TB),)

    # ---- VMEM limit from actual buffer sizes (weights x2 as headroom) -------------------
    vmem_limit = 2 * weight_bytes + 2 * TB * Dp * x_itemsize + 2 * TB * 4 + (4 << 20)
    vmem_limit = int(min(64 << 20, max(16 << 20, vmem_limit)))

    cost = pl.CostEstimate(
        flops=2 * B * (Dp * Hp + Hp * Hp + Hp),
        transcendentals=0,
        bytes_accessed=x.size * x_itemsize + weight_bytes + 4 + B * 4,
    )

    resident = dict(pipeline_mode=pl.Buffered(1))   # constant blocks: no 2nd VMEM buffer
    out = pl.pallas_call(
        _mlp_value_kernel,
        out_shape=jax.ShapeDtypeStruct((B, 1), jnp.float32),
        grid=grid,
        in_specs=[
            pl.BlockSpec((TB, Dp), lambda i: (i, 0)),               # x: streamed over batch
            pl.BlockSpec((Dp, Hp), lambda i: (0, 0), **resident),   # w1: VMEM-resident
            pl.BlockSpec((1, Hp), lambda i: (0, 0), **resident),    # b1
            pl.BlockSpec((Hp, Hp), lambda i: (0, 0), **resident),   # w2
            pl.BlockSpec((1, Hp), lambda i: (0, 0), **resident),    # b2
            pl.BlockSpec((Hp, 1), lambda i: (0, 0), **resident),    # w3
            pl.BlockSpec(memory_space=pltpu.MemorySpace.SMEM),      # b3: scalar in SMEM
        ],
        out_specs=pl.BlockSpec((TB, 1), lambda i: (i, 0)),
        compiler_params=pltpu.CompilerParams(
            dimension_semantics=("parallel",),
            vmem_limit_bytes=vmem_limit,
        ),
        cost_estimate=cost,
    )(x, w1p, b1p, w2p, b2p, w3p, b3s)

    return out


def init_params(key, obs_dim, hidden_dim):
    """PyTorch-Linear-style init: U(-1/sqrt(fan_in), 1/sqrt(fan_in)).
    Weights stored as [in_features, out_features]; biases as [1, out_features]."""
    dims = [(obs_dim, hidden_dim), (hidden_dim, hidden_dim), (hidden_dim, 1)]
    params = []
    for fan_in, fan_out in dims:
        key, kw, kb = jax.random.split(key, 3)
        bound = 1.0 / jnp.sqrt(float(fan_in))
        w = jax.random.uniform(kw, (fan_in, fan_out), jnp.float32, -bound, bound)
        b = jax.random.uniform(kb, (1, fan_out), jnp.float32, -bound, bound)
        params += [w, b]
    return tuple(params)


def reference_forward(obs, params, compute_dtype=jnp.float32):
    """Pure-JAX reference of the same MLP (optionally with bf16 matmul operands)."""
    w1, b1, w2, b2, w3, b3 = params
    x = obs.reshape(obs.shape[0], -1).astype(jnp.float32)

    def mm(a, w):
        return jnp.dot(a.astype(compute_dtype), w.astype(compute_dtype),
                       preferred_element_type=jnp.float32)

    h1 = jnp.maximum(mm(x, w1) + b1, 0.0)
    h2 = jnp.maximum(mm(h1, w2) + b2, 0.0)
    return mm(h2, w3) + b3


if __name__ == "__main__":
    # Small shapes consistent with the module: obs_shape=(4, 16, 16), hidden_dim=32, batch=2.
    key = jax.random.PRNGKey(0)
    obs_shape = (4, 16, 16)
    hidden_dim = 32
    batch = 2
    obs_dim = math.prod(obs_shape)

    k_obs, k_param = jax.random.split(key)
    obs = jax.random.normal(k_obs, (batch,) + obs_shape, jnp.float32)
    params = init_params(k_param, obs_dim, hidden_dim)
    prepared = prepare_params(params)   # one-time pad/cast, hoisted out of the forward path

    out = jax.block_until_ready(mlp_value_forward(obs, prepared))
    assert out.shape == (batch, 1)

    ref_bf16 = reference_forward(obs, params, compute_dtype=jnp.bfloat16)
    ref_f32 = reference_forward(obs, params, compute_dtype=jnp.float32)
    assert jnp.allclose(out, ref_bf16, atol=1e-3, rtol=1e-3)
    assert jnp.allclose(out, ref_f32, atol=1e-1, rtol=0.0)

    # Multi-tile grid with a partial trailing block (300 rows, TB=128 -> grid of 3, last
    # tile has 44 valid rows; out-of-bounds rows are masked on writeback).
    batch2 = 300
    obs2 = jax.random.normal(jax.random.PRNGKey(1), (batch2,) + obs_shape, jnp.float32)
    out2 = jax.block_until_ready(mlp_value_forward(obs2, prepared, block_b=128))
    ref2 = reference_forward(obs2, params, compute_dtype=jnp.bfloat16)
    assert out2.shape == (batch2, 1)
    assert jnp.allclose(out2, ref2, atol=1e-3, rtol=1e-3)

    # Auto-tile path (block_b=None) on the same data.
    out3 = jax.block_until_ready(mlp_value_forward(obs2, prepared))
    assert out3.shape == (batch2, 1)
    assert jnp.allclose(out3, ref2, atol=1e-3, rtol=1e-3)

    print("KERNEL_OK")
</pallas_src>

<mosaic_0001>
module attributes {stable_mosaic.version = 11 : i64} {
  func.func @_mlp_value_kernel(%arg0: i32, %arg1: memref<2x1024xf32, #tpu.memory_space<vmem>>, %arg2: memref<1024x128xbf16, #tpu.memory_space<vmem>>, %arg3: memref<1x128xf32, #tpu.memory_space<vmem>>, %arg4: memref<128x128xbf16, #tpu.memory_space<vmem>>, %arg5: memref<1x128xf32, #tpu.memory_space<vmem>>, %arg6: memref<128x1xbf16, #tpu.memory_space<vmem>>, %arg7: memref<1x1xf32, #tpu.memory_space<smem>>, %arg8: memref<2x1xf32, #tpu.memory_space<vmem>>) attributes {dimension_semantics = [#tpu.dimension_semantics<parallel>], iteration_bounds = array<i64: 1>, scalar_prefetch = 0 : i64, scratch_operands = 0 : i64, tpu.core_type = #tpu.core_type<tc>, window_params = [{transform_indices = @transform_0, window_bounds = array<i64: 2, 1024>}, {pipeline_mode = #tpu.pipeline_mode<synchronous>, transform_indices = @transform_1, window_bounds = array<i64: 1024, 128>}, {pipeline_mode = #tpu.pipeline_mode<synchronous>, transform_indices = @transform_2, window_bounds = array<i64: 1, 128>}, {pipeline_mode = #tpu.pipeline_mode<synchronous>, transform_indices = @transform_3, window_bounds = array<i64: 128, 128>}, {pipeline_mode = #tpu.pipeline_mode<synchronous>, transform_indices = @transform_4, window_bounds = array<i64: 1, 128>}, {pipeline_mode = #tpu.pipeline_mode<synchronous>, transform_indices = @transform_5, window_bounds = array<i64: 128, 1>}, {transform_indices = @transform_6, window_bounds = array<i64: 1, 1>}, {transform_indices = @transform_7, window_bounds = array<i64: 2, 1>}]} {
    %c0 = arith.constant 0 : index
    %c0_0 = arith.constant 0 : index
    %0 = vector.load %arg1[%c0, %c0_0] : memref<2x1024xf32, #tpu.memory_space<vmem>>, vector<2x1024xf32>
    %1 = arith.truncf %0 : vector<2x1024xf32> to vector<2x1024xbf16>
    %c0_1 = arith.constant 0 : index
    %c0_2 = arith.constant 0 : index
    %2 = vector.load %arg2[%c0_1, %c0_2] : memref<1024x128xbf16, #tpu.memory_space<vmem>>, vector<1024x128xbf16>
    %cst = arith.constant dense<0.000000e+00> : vector<2x128xf32>
    %3 = tpu.matmul %1, %2, %cst {dimension_numbers = #tpu.dot_dimension_numbers<[1], [0], [0], [1], [0, 0, 1, 1], [], []>} : vector<2x1024xbf16>, vector<1024x128xbf16>, vector<2x128xf32> -> vector<2x128xf32>
    %c0_3 = arith.constant 0 : index
    %c0_4 = arith.constant 0 : index
    %4 = vector.load %arg3[%c0_3, %c0_4] : memref<1x128xf32, #tpu.memory_space<vmem>>, vector<1x128xf32>
    %5 = vector.broadcast %4 : vector<1x128xf32> to vector<2x128xf32>
    %6 = arith.addf %3, %5 : vector<2x128xf32>
    %cst_5 = arith.constant 0.000000e+00 : f32
    %7 = vector.broadcast %cst_5 : f32 to vector<2x128xf32>
    %8 = arith.maximumf %6, %7 : vector<2x128xf32>
    %9 = arith.truncf %8 : vector<2x128xf32> to vector<2x128xbf16>
    %c0_6 = arith.constant 0 : index
    %c0_7 = arith.constant 0 : index
    %10 = vector.load %arg4[%c0_6, %c0_7] : memref<128x128xbf16, #tpu.memory_space<vmem>>, vector<128x128xbf16>
    %cst_8 = arith.constant dense<0.000000e+00> : vector<2x128xf32>
    %11 = tpu.matmul %9, %10, %cst_8 {dimension_numbers = #tpu.dot_dimension_numbers<[1], [0], [0], [1], [0, 0, 1, 1], [], []>} : vector<2x128xbf16>, vector<128x128xbf16>, vector<2x128xf32> -> vector<2x128xf32>
    %c0_9 = arith.constant 0 : index
    %c0_10 = arith.constant 0 : index
    %12 = vector.load %arg5[%c0_9, %c0_10] : memref<1x128xf32, #tpu.memory_space<vmem>>, vector<1x128xf32>
    %13 = vector.broadcast %12 : vector<1x128xf32> to vector<2x128xf32>
    %14 = arith.addf %11, %13 : vector<2x128xf32>
    %cst_11 = arith.constant 0.000000e+00 : f32
    %15 = vector.broadcast %cst_11 : f32 to vector<2x128xf32>
    %16 = arith.maximumf %14, %15 : vector<2x128xf32>
    %17 = arith.truncf %16 : vector<2x128xf32> to vector<2x128xbf16>
    %c0_12 = arith.constant 0 : index
    %c0_13 = arith.constant 0 : index
    %18 = vector.load %arg6[%c0_12, %c0_13] : memref<128x1xbf16, #tpu.memory_space<vmem>>, vector<128x1xbf16>
    %cst_14 = arith.constant dense<0.000000e+00> : vector<2x1xf32>
    %19 = tpu.matmul %17, %18, %cst_14 {dimension_numbers = #tpu.dot_dimension_numbers<[1], [0], [0], [1], [0, 0, 1, 1], [], []>} : vector<2x128xbf16>, vector<128x1xbf16>, vector<2x1xf32> -> vector<2x1xf32>
    %c0_15 = arith.constant 0 : index
    %c0_16 = arith.constant 0 : index
    %20 = memref.load %arg7[%c0_15, %c0_16] : memref<1x1xf32, #tpu.memory_space<smem>>
    %21 = vector.broadcast %20 : f32 to vector<2x1xf32>
    %22 = arith.addf %19, %21 : vector<2x1xf32>
    %c0_17 = arith.constant 0 : index
    %c0_18 = arith.constant 0 : index
    %23 = vector.load %arg8[%c0_17, %c0_18] : memref<2x1xf32, #tpu.memory_space<vmem>>, vector<2x1xf32>
    tpu.vector_store %arg8[%c0_17, %c0_18], %22 {strides = array<i32>} : memref<2x1xf32, #tpu.memory_space<vmem>>, vector<2x1xf32>,
    return
  }
  func.func @transform_0(%arg0: i32) -> (i32, i32) {
    %c0_i32 = arith.constant 0 : i32
    %c0_i32_0 = arith.constant 0 : i32
    return %arg0, %c0_i32 : i32, i32
  }
  func.func @transform_1(%arg0: i32) -> (i32, i32) {
    %c0_i32 = arith.constant 0 : i32
    %c0_i32_0 = arith.constant 0 : i32
    %c0_i32_1 = arith.constant 0 : i32
    return %c0_i32, %c0_i32_0 : i32, i32
  }
  func.func @transform_2(%arg0: i32) -> (i32, i32) {
    %c0_i32 = arith.constant 0 : i32
    %c0_i32_0 = arith.constant 0 : i32
    %c0_i32_1 = arith.constant 0 : i32
    return %c0_i32, %c0_i32_0 : i32, i32
  }
  func.func @transform_3(%arg0: i32) -> (i32, i32) {
    %c0_i32 = arith.constant 0 : i32
    %c0_i32_0 = arith.constant 0 : i32
    %c0_i32_1 = arith.constant 0 : i32
    return %c0_i32, %c0_i32_0 : i32, i32
  }
  func.func @transform_4(%arg0: i32) -> (i32, i32) {
    %c0_i32 = arith.constant 0 : i32
    %c0_i32_0 = arith.constant 0 : i32
    %c0_i32_1 = arith.constant 0 : i32
    return %c0_i32, %c0_i32_0 : i32, i32
  }
  func.func @transform_5(%arg0: i32) -> (i32, i32) {
    %c0_i32 = arith.constant 0 : i32
    %c0_i32_0 = arith.constant 0 : i32
    %c0_i32_1 = arith.constant 0 : i32
    return %c0_i32, %c0_i32_0 : i32, i32
  }
  func.func @transform_6(%arg0: i32) -> (i32, i32) {
    %c0_i32 = arith.constant 0 : i32
    %c0_i32_0 = arith.constant 0 : i32
    %c0_i32_1 = arith.constant 0 : i32
    return %c0_i32, %c0_i32_0 : i32, i32
  }
  func.func @transform_7(%arg0: i32) -> (i32, i32) {
    %c0_i32 = arith.constant 0 : i32
    %c0_i32_0 = arith.constant 0 : i32
    return %arg0, %c0_i32 : i32, i32
  }
}

</mosaic_0001>

<bundles_post_ra>
// kernel: tpu_custom_call.1
= control target key start
LH: loop header
LB: loop body
LE: loop exit
PB: predicated region body
PF: predicated region fallthrough
CT: control target
= control target key end

     0   :  { %13 = vsyncpa [#allocation4], 0  ;;  %s1539_s0 = inlined_call_operand.vmem [shape: f32[2,1024], index: 0, kind: input, shape index: {}]   ;;  %s1540_s1 = inlined_call_operand.hbm [shape: bf16[1024,128], index: 1, kind: input, shape index: {}]   ;;  %s1541_s2 = inlined_call_operand.hbm [shape: f32[1,128], index: 2, kind: input, shape index: {}]   ;;  %s1542_s3 = inlined_call_operand.vmem [shape: bf16[128,128], index: 3, kind: input, shape index: {}]   ;;  %s1543_s4 = inlined_call_operand.vmem [shape: f32[1,128], index: 4, kind: input, shape index: {}]   ;;  %s1544_s5 = inlined_call_operand.vmem [shape: bf16[128,1], index: 5, kind: input, shape index: {}]   ;;  %s1545_s6 = inlined_call_operand.<no memory space> [shape: f32[1,1], index: 6, kind: input, shape index: {}]   ;;  %s1546_s7 = inlined_call_operand.vmem [shape: f32[2,1], index: 7, kind: output, shape index: {}]  }
   0x1   :  { %14 = vsyncpa [#allocation6], 0  ;;  %s1381_s24 = smov [#allocation3]   ;;  %s1333_s28 = scalar_lea.hbm %s1540_s1, 8192 }
   0x2   :  { %s22_s25 = sshll.u32 %s1381_s24, 4  ;;  %p1334_p0 = scmp.ne.s32.totalorder %s1540_s1, %s1333_s28  ;;  %s23_s25 = int_to_ptr.vmem [resolvable:$true] %s22_s25 }
   0x3   :  { %p1337_p1 = scmp.lt.u32.totalorder %s1333_s28, %s1540_s1 }
   0x5   :  { %p1339_p2 = pnand %p1337_p1, %p1334_p0 }
   0x7   :  { %1342 = shalt.err (!%p1339_p2)
}
   0x8   :  { %s1343_s10 = scalar_lea.vmem %s23_s25, 8192  ;;  %p1348_p4 = scmp.lt.s32.totalorder %s23_s25, %s23_s25 }
   0x9   :  { %p1344_p3 = scmp.ne.s32.totalorder %s23_s25, %s1343_s10  ;;  %p1349_p5 = scmp.lt.s32.totalorder %s1343_s10, %s1343_s10 }
   0xb   :  { %p1350_p6 = por %p1349_p5, %p1348_p4 }
   0xd   :  { %p1351_p7 = pnand %p1350_p6, %p1344_p3 }
   0xf   :  { %1354 = shalt.err (!%p1351_p7)
}
  0x10   :  { %s1382_s11 = smov 64   ;;  %s1383_s12 = smov 4  }
  0x11   :  { %28 = dma.hbm_to_vmem [thread:$0]  %s1540_s1, 8192, %s23_s25, [#allocation4], %s1382_s11, %s1382_s11, %s1383_s12  }
  0x12   :  { %s1384_s15 = smov [#allocation5]   ;;  %s1355_s19 = scalar_lea.hbm %s1541_s2, 16 }
  0x13   :  { %s35_s16 = sshll.u32 %s1384_s15, 4  ;;  %p1356_p8 = scmp.ne.s32.totalorder %s1541_s2, %s1355_s19  ;;  %s36_s16 = int_to_ptr.vmem [resolvable:$true] %s35_s16 }
  0x14   :  { %p1359_p9 = scmp.lt.u32.totalorder %s1355_s19, %s1541_s2 }
  0x16   :  { %p1361_p10 = pnand %p1359_p9, %p1356_p8 }
  0x18   :  { %1364 = shalt.err (!%p1361_p10)
}
  0x19   :  { %s1365_s24 = scalar_lea.vmem %s36_s16, 16  ;;  %s1369_s1 = scalar_lea.vmem %s36_s16, 32 }
  0x1a   :  { %p1366_p11 = scmp.ne.s32.totalorder %s36_s16, %s1365_s24  ;;  %p1370_p12 = scmp.lt.s32.totalorder %s36_s16, %s36_s16 }
  0x1b   :  { %p1371_p13 = scmp.lt.s32.totalorder %s1369_s1, %s1365_s24 }
  0x1d   :  { %p1372_p0 = por %p1371_p13, %p1370_p12 }
  0x1f   :  { %p1373_p1 = pnand %p1372_p0, %p1366_p11 }
  0x21   :  { %1376 = shalt.err (!%p1373_p1)
}
  0x22   :  { %38 = dma.hbm_to_vmem [thread:$0]  %s1541_s2, 16, %s36_s16, [#allocation6]  }
  0x23   :  { %1377 = dma.done.wait [#allocation4], 8192  }
  0x24   :  { %1378 = vsyncadd [#allocation4], 4294959104 }
  0x25   :  { %1379 = dma.done.wait [#allocation6], 16  }
  0x26   :  { %1380 = vsyncadd [#allocation6], 4294967280  ;;  %v1251_v0 = vld [vmem:[#allocation3 + $0x40] sm:$0xff]   ;;  %v1255_v4 = vld [vmem:[#allocation3 + $0x48] sm:$0xff]   ;;  %v1385_v22 = vmov 1983009808   ;;  %v62_v24 = vlaneseq }
  0x27   :  { %v1252_v1 = vld [vmem:[#allocation3 + $0xc0] sm:$0xff]   ;;  %1098 = vmatprep.subr.bf16.mxu0 %v1251_v0  ;;  %v1256_v5 = vld [vmem:[#allocation3 + $0xc8] sm:$0xff]   ;;  %v1259_v8 = vld [vmem:[#allocation3 + $0x50] sm:$0xff]   ;;  %v60_v23 = vunpack.c.l.s4 %v1385_v22  ;;  %vm1387_vm0 = vmmov 0   ;;  %vm1008_vm1 = vcmask 1024  }
  0x28   :  { %v1253_v2 = vld [vmem:[#allocation3] sm:$0xff]   ;;  %1120 = vmatprep.subr.bf16.mxu1 %v1252_v1  ;;  %v1257_v6 = vld [vmem:[#allocation3 + $0x8] sm:$0xff]   ;;  %v1260_v9 = vld [vmem:[#allocation3 + $0xd0] sm:$0xff]   ;;  %v63_v30 = vshrl.u32 %v62_v24, 7 }
  0x29   :  { %v1254_v3 = vld [vmem:[#allocation3 + $0x80] sm:$0xff]   ;;  %1099 = vmatpush3.bf16.msra.mxu0 %v1253_v2  ;;  %v1258_v7 = vld [vmem:[#allocation3 + $0x88] sm:$0xff]   ;;  %v1261_v10 = vld [vmem:[#allocation3 + $0x10] sm:$0xff]   ;;  %v61_v29 = vunpack.c.0.s8 %v60_v23 }
  0x2a   :  { %1121 = vmatpush3.bf16.msra.mxu1 %v1254_v3  ;;  %1100 = vmatprep.subr.bf16.mxu0 %v1255_v4  ;;  %v1262_v11 = vld [vmem:[#allocation3 + $0x90] sm:$0xff]   ;;  %v1263_v12 = vld [vmem:[#allocation3 + $0x58] sm:$0xff]   ;;  %v1267_v16 = vld [vmem:[#allocation3 + $0x60] sm:$0xff]  }
  0x2b   :  { %1122 = vmatprep.subr.bf16.mxu1 %v1256_v5  ;;  %v1264_v13 = vld [vmem:[#allocation3 + $0xd8] sm:$0xff]   ;;  %v1268_v17 = vld [vmem:[#allocation3 + $0xe0] sm:$0xff]   ;;  %v1271_v20 = vld [vmem:[#allocation3 + $0x68] sm:$0xff]   ;;  %v1452_v35 = vsub.s32 %v61_v29, %v63_v30 }
  0x2c   :  { %v1265_v14 = vld [vmem:[#allocation3 + $0x18] sm:$0xff]   ;;  %v1269_v18 = vld [vmem:[#allocation3 + $0x20] sm:$0xff]   ;;  %v1272_v21 = vld [vmem:[#allocation3 + $0xe8] sm:$0xff]  }
  0x2d   :  { %1101 = vmatpush3.bf16.msra.mxu0 %v1257_v6  ;;  %v1266_v15 = vld [vmem:[#allocation3 + $0x98] sm:$0xff]   ;;  %v1270_v19 = vld [vmem:[#allocation3 + $0xa0] sm:$0xff]   ;;  %v1273_v25 = vld [vmem:[#allocation3 + $0x28] sm:$0xff]  }
  0x2e   :  { %1123 = vmatpush3.bf16.msra.mxu1 %v1258_v7  ;;  %1102 = vmatprep.subr.bf16.mxu0 %v1259_v8  ;;  %v1274_v26 = vld [vmem:[#allocation3 + $0xa8] sm:$0xff]   ;;  %v1275_v27 = vld [vmem:[#allocation3 + $0x70] sm:$0xff]   ;;  %v1279_v33 = vld [vmem:[#allocation3 + $0x78] sm:$0xff]  }
  0x2f   :  { %1124 = vmatprep.subr.bf16.mxu1 %v1260_v9  ;;  %v1276_v28 = vld [vmem:[#allocation3 + $0xf0] sm:$0xff]   ;;  %v1280_v34 = vld [vmem:[#allocation3 + $0xf8] sm:$0xff]   ;;  %v54_v38 = vld [vmem:[%s1539_s0] sm:$0xff] }
  0x30   :  { %v1277_v31 = vld [vmem:[#allocation3 + $0x30] sm:$0xff]   ;;  %v1281_v36 = vld [vmem:[#allocation3 + $0x38] sm:$0xff]   ;;  %v65_v39 = vrot.slane %v54_v38, %v1452_v35  ;;  %v58_v40 = vcombine.high %v54_v38, %v54_v38  ;;  %v1284_v41 = vld [vmem:[#allocation3 + $0x140] sm:$0xff]  }
  0x31   :  { %1103 = vmatpush3.bf16.msra.mxu0 %v1261_v10  ;;  %v1278_v32 = vld [vmem:[#allocation3 + $0xb0] sm:$0xff]   ;;  %v1282_v37 = vld [vmem:[#allocation3 + $0xb8] sm:$0xff]   ;;  %v1285_v42 = vld [vmem:[#allocation3 + $0x1c0] sm:$0xff]  }
  0x32   :  { %1125 = vmatpush3.bf16.msra.mxu1 %v1262_v11  ;;  %1104 = vmatprep.subr.bf16.mxu0 %v1263_v12  ;;  %v73_v43 = vcombine.high %v65_v39, %v65_v39  ;;  %v72_v44 = vrot.slane %v58_v40, %v1452_v35  ;;  %v100_v45 = vpack.c.bf16 %v65_v39, %v65_v39  ;;  %v1286_v46 = vld [vmem:[#allocation3 + $0x100] sm:$0xff]   ;;  %v1288_v51 = vld [vmem:[#allocation3 + $0x148] sm:$0xff]   ;;  %v1292_v56 = vld [vmem:[#allocation3 + $0x150] sm:$0xff]  }
  0x33   :  { %1126 = vmatprep.subr.bf16.mxu1 %v1264_v13  ;;  %v1287_v49 = vld [vmem:[#allocation3 + $0x180] sm:$0xff]   ;;  %v1289_v53 = vld [vmem:[#allocation3 + $0x1c8] sm:$0xff]   ;;  %v1293_v57 = vld [vmem:[#allocation3 + $0x1d0] sm:$0xff]  }
  0x34   :  { %v101_v47 = vpack.c.bf16 %v73_v43, %v73_v43  ;;  %v74_v48 = vcombine.high %v72_v44, %v72_v44  ;;  %v102_v50 = vpack.c.bf16 %v72_v44, %v72_v44  ;;  %v1290_v54 = vld [vmem:[#allocation3 + $0x108] sm:$0xff]   ;;  %v1294_v58 = vld [vmem:[#allocation3 + $0x110] sm:$0xff]   ;;  %v1296_v60 = vld [vmem:[#allocation3 + $0x158] sm:$0xff]  }
  0x35   :  { %1105 = vmatpush3.bf16.msra.mxu0 %v1265_v14  ;;  %v1291_v55 = vld [vmem:[#allocation3 + $0x188] sm:$0xff]   ;;  %v1295_v59 = vld [vmem:[#allocation3 + $0x190] sm:$0xff]   ;;  %v1297_v61 = vld [vmem:[#allocation3 + $0x1d8] sm:$0xff]  }
  0x36   :  { %1127 = vmatpush3.bf16.msra.mxu1 %v1266_v15  ;;  %1106 = vmatprep.subr.bf16.mxu0 %v1267_v16  ;;  %v103_v52 = vpack.c.bf16 %v74_v48, %v74_v48  ;;  %v1298_v62 = vld [vmem:[#allocation3 + $0x118] sm:$0xff]   ;;  %v1300_v0 = vld [vmem:[#allocation3 + $0x160] sm:$0xff]   ;;  %v1304_v4 = vld [vmem:[#allocation3 + $0x168] sm:$0xff]  }
  0x37   :  { %1128 = vmatprep.subr.bf16.mxu1 %v1268_v17  ;;  %659 = vmatprep.mubr.bf16.mxu0 %v101_v47  ;;  %v1299_v63 = vld [vmem:[#allocation3 + $0x198] sm:$0xff]   ;;  %v1301_v1 = vld [vmem:[#allocation3 + $0x1e0] sm:$0xff]   ;;  %v1305_v5 = vld [vmem:[#allocation3 + $0x1e8] sm:$0xff]  }
  0x38   :  { %699 = vmatprep.mubr.bf16.mxu1 %v103_v52  ;;  %v1302_v2 = vld [vmem:[#allocation3 + $0x120] sm:$0xff]   ;;  %v1306_v6 = vld [vmem:[#allocation3 + $0x128] sm:$0xff]   ;;  %v1308_v8 = vld [vmem:[#allocation3 + $0x170] sm:$0xff]  }
  0x39   :  { %1107 = vmatpush3.bf16.msra.mxu0 %v1269_v18  ;;  %v1303_v3 = vld [vmem:[#allocation3 + $0x1a0] sm:$0xff]   ;;  %v1307_v7 = vld [vmem:[#allocation3 + $0x1a8] sm:$0xff]   ;;  %v1309_v9 = vld [vmem:[#allocation3 + $0x1f0] sm:$0xff]  }
  0x3a   :  { %1129 = vmatpush3.bf16.msra.mxu1 %v1270_v19  ;;  %1108 = vmatprep.subr.bf16.mxu0 %v1271_v20  ;;  %v1310_v10 = vld [vmem:[#allocation3 + $0x130] sm:$0xff]   ;;  %v1312_v12 = vld [vmem:[#allocation3 + $0x178] sm:$0xff]   ;;  %v55_v15 = vld [vmem:[%s1539_s0 + $0x8] sm:$0xff] }
  0x3b   :  { %1130 = vmatprep.subr.bf16.mxu1 %v1272_v21  ;;  %v1311_v11 = vld [vmem:[#allocation3 + $0x1b0] sm:$0xff]   ;;  %v1313_v13 = vld [vmem:[#allocation3 + $0x1f8] sm:$0xff]   ;;  %v82_v17 = vrot.slane %v55_v15, %v1452_v35  ;;  %v75_v18 = vcombine.high %v55_v15, %v55_v15  ;;  %v1329_v39 = vld [vmem:[%s1544_s5 + $0x20] sm:$0xff]  }
  0x3c   :  { %v1314_v14 = vld [vmem:[#allocation3 + $0x138] sm:$0xff]   ;;  %v1319_v29 = vld [vmem:[%s1542_s3 + $0x10] sm:$0xff]   ;;  %v1330_v40 = vld [vmem:[%s1544_s5 + $0x28] sm:$0xff]  }
  0x3d   :  { %1109 = vmatpush3.bf16.msra.mxu0 %v1273_v25  ;;  %v1315_v16 = vld [vmem:[#allocation3 + $0x1b8] sm:$0xff]   ;;  %v90_v19 = vcombine.high %v82_v17, %v82_v17  ;;  %v89_v20 = vrot.slane %v75_v18, %v1452_v35  ;;  %v104_v21 = vpack.c.bf16 %v82_v17, %v82_v17  ;;  %v1325_v35 = vld [vmem:[%s1544_s5] sm:$0xff]  }
  0x3e   :  { %1131 = vmatpush3.bf16.msra.mxu1 %v1274_v26  ;;  %1110 = vmatprep.subr.bf16.mxu0 %v1275_v27  ;;  %v1317_v26 = vld [vmem:[%s1542_s3] sm:$0xff]   ;;  %v1386_v27 = vmov 0.0   ;;  %v1320_v30 = vld [vmem:[%s1542_s3 + $0x18] sm:$0xff]  }
  0x3f   :  { %1132 = vmatprep.subr.bf16.mxu1 %v1276_v28  ;;  %v105_v22 = vpack.c.bf16 %v90_v19, %v90_v19  ;;  %v91_v23 = vcombine.high %v89_v20, %v89_v20  ;;  %v106_v24 = vpack.c.bf16 %v89_v20, %v89_v20  ;;  %v1318_v28 = vld [vmem:[%s1542_s3 + $0x8] sm:$0xff]   ;;  %v1328_v38 = vld [vmem:[%s1544_s5 + $0x18] sm:$0xff]  }
  0x41   :  { %1111 = vmatpush3.bf16.msra.mxu0 %v1277_v31  ;;  %v107_v25 = vpack.c.bf16 %v91_v23, %v91_v23  ;;  %v1321_v31 = vld [vmem:[%s1542_s3 + $0x20] sm:$0xff]  }
  0x42   :  { %1133 = vmatpush3.bf16.msra.mxu1 %v1278_v32  ;;  %1112 = vmatprep.subr.bf16.mxu0 %v1279_v33  ;;  %v1322_v32 = vld [vmem:[%s1542_s3 + $0x28] sm:$0xff]   ;;  %v1323_v33 = vld [vmem:[%s1542_s3 + $0x30] sm:$0xff]  }
  0x43   :  { %1134 = vmatprep.subr.bf16.mxu1 %v1280_v34  ;;  %v1324_v34 = vld [vmem:[%s1542_s3 + $0x38] sm:$0xff]  }
  0x45   :  { %1113 = vmatpush3.bf16.msra.mxu0 %v1281_v36  ;;  %v1326_v36 = vld [vmem:[%s1544_s5 + $0x8] sm:$0xff]  }
  0x46   :  { %1135 = vmatpush3.bf16.msra.mxu1 %v1282_v37  ;;  %1142 = vmatprep.subr.bf16.mxu0 %v1284_v41  ;;  %v1327_v37 = vld [vmem:[%s1544_s5 + $0x10] sm:$0xff]  }
  0x47   :  { %1164 = vmatprep.subr.bf16.mxu1 %v1285_v42  ;;  %v1016_v42 = vld [vmem:[#allocation5] ss:$0 sm:$0xff] }
  0x48   :  { %660 = vmatmul.mubr.bf16.vlgmr.msra.gmra.mrb[0].mxu0 %v100_v45 }
  0x49   :  { %1143 = vmatpush3.bf16.msra.mxu0 %v1286_v46  ;;  %700 = vmatmul.mubr.bf16.vlgmr.msra.gmra.mrb[0].mxu1 %v102_v50 }
  0x4a   :  { %1144 = vmatprep.subr.bf16.mxu0 %v1288_v51  ;;  %1165 = vmatpush3.bf16.msra.mxu1 %v1287_v49 }
  0x4b   :  { %1166 = vmatprep.subr.bf16.mxu1 %v1289_v53  ;;  %739 = vmatprep.mubr.bf16.mxu0 %v105_v22 }
  0x4c   :  { %779 = vmatprep.mubr.bf16.mxu1 %v107_v25 }
  0x4d   :  { %1145 = vmatpush3.bf16.msra.mxu0 %v1290_v54 }
  0x4e   :  { %1146 = vmatprep.subr.bf16.mxu0 %v1292_v56  ;;  %1167 = vmatpush3.bf16.msra.mxu1 %v1291_v55 }
  0x4f   :  { %1168 = vmatprep.subr.bf16.mxu1 %v1293_v57 }
  0x51   :  { %1147 = vmatpush3.bf16.msra.mxu0 %v1294_v58 }
  0x52   :  { %1148 = vmatprep.subr.bf16.mxu0 %v1296_v60  ;;  %1169 = vmatpush3.bf16.msra.mxu1 %v1295_v59 }
  0x53   :  { %1170 = vmatprep.subr.bf16.mxu1 %v1297_v61 }
  0x55   :  { %1149 = vmatpush3.bf16.msra.mxu0 %v1298_v62 }
  0x56   :  { %1150 = vmatprep.subr.bf16.mxu0 %v1300_v0  ;;  %1171 = vmatpush3.bf16.msra.mxu1 %v1299_v63 }
  0x57   :  { %1172 = vmatprep.subr.bf16.mxu1 %v1301_v1 }
  0x59   :  { %1151 = vmatpush3.bf16.msra.mxu0 %v1302_v2 }
  0x5a   :  { %1152 = vmatprep.subr.bf16.mxu0 %v1304_v4  ;;  %1173 = vmatpush3.bf16.msra.mxu1 %v1303_v3  ;;  %v1331_v4 = vld [vmem:[%s1544_s5 + $0x30] sm:$0xff]  }
  0x5b   :  { %1174 = vmatprep.subr.bf16.mxu1 %v1305_v5  ;;  %v1332_v5 = vld [vmem:[%s1544_s5 + $0x38] sm:$0xff]  }
  0x5d   :  { %1153 = vmatpush3.bf16.msra.mxu0 %v1306_v6  ;;  %v1081_v6 = vld [vmem:[%s1543_s4] ss:$0 sm:$0xff] }
  0x5e   :  { %1154 = vmatprep.subr.bf16.mxu0 %v1308_v8  ;;  %1175 = vmatpush3.bf16.msra.mxu1 %v1307_v7 }
  0x5f   :  { %1176 = vmatprep.subr.bf16.mxu1 %v1309_v9 }
  0x61   :  { %1155 = vmatpush3.bf16.msra.mxu0 %v1310_v10 }
  0x62   :  { %1156 = vmatprep.subr.bf16.mxu0 %v1312_v12  ;;  %1177 = vmatpush3.bf16.msra.mxu1 %v1311_v11 }
  0x63   :  { %1178 = vmatprep.subr.bf16.mxu1 %v1313_v13 }
  0x65   :  { %1157 = vmatpush3.bf16.msra.mxu0 %v1314_v14  ;;  %v919_v14 = vstv %s1545_s6 }
  0x66   :  { %1179 = vmatpush3.bf16.msra.mxu1 %v1315_v16  ;;  %1204 = vmatprep.subr.bf16.mxu0 %v1386_v27 }
  0x67   :  { %1224 = vmatprep.subr.bf16.mxu1 %v1386_v27 }
  0x68   :  { %740 = vmatmul.mubr.bf16.vlgmr.msra.gmra.mrb[4].mxu0 %v104_v21 }
  0x69   :  { %780 = vmatmul.mubr.bf16.vlgmr.msra.gmra.mrb[4].mxu1 %v106_v24  ;;  %1205 = vmatpush3.bf16.msra.mxu0 %v1317_v26 }
  0x6a   :  { %1206 = vmatprep.subr.bf16.mxu0 %v1386_v27  ;;  %1220 = vmatprep.mubr.msk.bf16.mxu0 %vm1387_vm0, %v1386_v27 }
  0x6b   :  { %1240 = vmatprep.mubr.msk.bf16.mxu1 %vm1387_vm0, %v1386_v27  ;;  %1225 = vmatpush3.bf16.msra.mxu1 %v1325_v35 }
  0x6c   :  { %1226 = vmatprep.subr.bf16.mxu1 %v1386_v27 }
  0x6d   :  { %1207 = vmatpush3.bf16.msra.mxu0 %v1318_v28 }
  0x6e   :  { %1208 = vmatprep.subr.bf16.mxu0 %v1386_v27 }
  0x6f   :  { %1227 = vmatpush3.bf16.msra.mxu1 %v1326_v36 }
  0x70   :  { %1228 = vmatprep.subr.bf16.mxu1 %v1386_v27 }
  0x71   :  { %1209 = vmatpush3.bf16.msra.mxu0 %v1319_v29 }
  0x72   :  { %1210 = vmatprep.subr.bf16.mxu0 %v1386_v27 }
  0x73   :  { %1229 = vmatpush3.bf16.msra.mxu1 %v1327_v37 }
  0x74   :  { %1230 = vmatprep.subr.bf16.mxu1 %v1386_v27 }
  0x75   :  { %1211 = vmatpush3.bf16.msra.mxu0 %v1320_v30 }
  0x76   :  { %1212 = vmatprep.subr.bf16.mxu0 %v1386_v27 }
  0x77   :  { %1231 = vmatpush3.bf16.msra.mxu1 %v1328_v38 }
  0x78   :  { %1232 = vmatprep.subr.bf16.mxu1 %v1386_v27 }
  0x79   :  { %1213 = vmatpush3.bf16.msra.mxu0 %v1321_v31 }
  0x7a   :  { %1214 = vmatprep.subr.bf16.mxu0 %v1386_v27 }
  0x7b   :  { %1233 = vmatpush3.bf16.msra.mxu1 %v1329_v39 }
  0x7c   :  { %1234 = vmatprep.subr.bf16.mxu1 %v1386_v27 }
  0x7d   :  { %1215 = vmatpush3.bf16.msra.mxu0 %v1322_v32 }
  0x7e   :  { %1216 = vmatprep.subr.bf16.mxu0 %v1386_v27 }
  0x7f   :  { %1235 = vmatpush3.bf16.msra.mxu1 %v1330_v40 }
  0x80   :  { %1236 = vmatprep.subr.bf16.mxu1 %v1386_v27 }
  0x81   :  { %1217 = vmatpush3.bf16.msra.mxu0 %v1323_v33 }
  0x82   :  { %1218 = vmatprep.subr.bf16.mxu0 %v1386_v27 }
  0x83   :  { %1237 = vmatpush3.bf16.msra.mxu1 %v1331_v4 }
  0x84   :  { %1238 = vmatprep.subr.bf16.mxu1 %v1386_v27 }
  0x85   :  { %1219 = vmatpush3.bf16.msra.mxu0 %v1324_v34 }
  0x87   :  { %1239 = vmatpush3.bf16.msra.mxu1 %v1332_v5 }
 0x11b   :  { %v1114_v41 = vpop.f32.mrb[0].mxu0 }
 0x11c   :  { %v1115_v43 = vpop.f32.mrb[1].mxu0  ;;  %v1136_v44 = vpop.f32.mrb[0].mxu1 }
 0x11d   :  { %v1116_v45 = vadd.f32 %v1115_v43, %v1114_v41  ;;  %v1117_v46 = vpop.f32.mrb[2].mxu0  ;;  %v1137_v47 = vpop.f32.mrb[1].mxu1 }
 0x11e   :  { %v1118_v48 = vpop.f32.mrb[3].mxu0  ;;  %v1138_v50 = vadd.f32 %v1137_v47, %v1136_v44  ;;  %v1139_v51 = vpop.f32.mrb[2].mxu1 }
 0x11f   :  { %v662_v49 = vadd.f32 %v1116_v45, %v1016_v42  ;;  %v1140_v52 = vpop.f32.mrb[3].mxu1 }
 0x121   :  { %v702_v53 = vadd.f32 %v1138_v50, %v662_v49 }
 0x13b   :  { %v1158_v54 = vpop.f32.mrb[4].mxu0 }
 0x13c   :  { %v1159_v55 = vpop.f32.mrb[5].mxu0  ;;  %v1180_v56 = vpop.f32.mrb[4].mxu1 }
 0x13d   :  { %v1160_v57 = vadd.f32 %v1159_v55, %v1158_v54  ;;  %v1161_v58 = vpop.f32.mrb[6].mxu0  ;;  %v1181_v59 = vpop.f32.mrb[5].mxu1 }
 0x13e   :  { %v1162_v60 = vpop.f32.mrb[7].mxu0  ;;  %v1182_v62 = vadd.f32 %v1181_v59, %v1180_v56  ;;  %v1183_v63 = vpop.f32.mrb[6].mxu1 }
 0x13f   :  { %v742_v61 = vadd.f32 %v1160_v57, %v702_v53  ;;  %v1184_v0 = vpop.f32.mrb[7].mxu1 }
 0x141   :  { %v782_v1 = vadd.f32 %v1182_v62, %v742_v61 }
 0x143   :  { %v787_v2 = vmax.f32 %v782_v1, 0.0 }
 0x145   :  { %v788_v3 = vpack.c.bf16 %v787_v2, %v787_v2 }
 0x147   :  { %1221 = vmatmul.mubr.bf16.vlgmr.msra.gmra.mrb[8].mxu0 %v788_v3 }
 0x21a   :  { %v894_v7 = vpop.f32.mrb[8].mxu0 }
 0x21b   :  { %v895_v8 = vadd.f32 %v1081_v6, %v894_v7  ;;  %v1222_v9 = vpop.f32.mrb[9].mxu0 }
 0x21c   :  { %v897_v10 = vpop.f32.mrb[10].mxu0 }
 0x21d   :  { %v900_v11 = vmax.f32 %v895_v8, 0.0  ;;  %v1223_v12 = vpop.f32.mrb[11].mxu0 }
 0x21f   :  { %v901_v13 = vpack.c.bf16 %v900_v11, %v900_v11 }
 0x221   :  { %1241 = vmatmul.mubr.bf16.vlgmr.msra.gmra.mrb[8].mxu1 %v901_v13 }
 0x2f4   :  { %v1002_v15 = vpop.f32.mrb[8].mxu1 }
 0x2f5   :  { %v1003_v16 = vadd.f32 %v1002_v15, %v919_v14  ;;  %v1242_v17 = vpop.f32.mrb[9].mxu1 }
 0x2f6   :  { %v1005_v18 = vpop.f32.mrb[10].mxu1 }
 0x2f7   :  { %1009 = vst.msk [vmem:[%s1546_s7] sm:$0x3] %vm1008_vm1, %v1003_v16  ;;  %v1243_v19 = vpop.f32.mrb[11].mxu1 }
 0x2f8   :  { %1014 = vsyncpa [#allocation4], 1 }
 0x2f9   :  { %1015 = vsyncpa [#allocation6], 1 }

</bundles_post_ra>
